<compile_context>
chip_gen: v7x
topology: tpu7x:2x2x1
jax: 0.10.0
libtpu: 0.0.40
codegen_flags: <defaults>
</compile_context>

<pallas_src>
import functools

import jax
import jax.numpy as jnp
from jax.experimental import pallas as pl
from jax.experimental.pallas import tpu as pltpu


# ----------------------------- kernels ------------------------------------


def pool_kernel(x_ref, sum_ref):
    """Accumulate per-lane spatial sums for one batch element.

    x_ref:   (1, T, L)  lane-packed input tile
    sum_ref: (1, 1, L)  f32 accumulator (resident across the spatial axis)
    """
    @pl.when(pl.program_id(1) == 0)
    def _init():
        sum_ref[...] = jnp.zeros_like(sum_ref)

    x = x_ref[0]                                        # (T, L)
    # Spatial reduction on the MXU (ones-vector matmul) instead of an XLU
    # cross-sublane reduction; accumulate in f32.
    ones = jnp.ones((1, x.shape[0]), dtype=x.dtype)
    partial = jnp.dot(ones, x, preferred_element_type=jnp.float32)   # (1, L)
    sum_ref[...] += partial[None]


def excite_kernel(sum_ref, w1_ref, b1_ref, w2_ref, b2_ref, s_ref,
                  *, inv_wh, pack, chans):
    """pooled -> relu(1x1 conv) -> 1x1 conv for ALL batches in one shot.

    sum_ref: (B, 1, L) f32 lane-packed spatial sums
    w1_ref : (C, Cr), b1_ref: (1, Cr)
    w2_ref : (Cr, L) lane-replicated, b2_ref: (1, L) lane-replicated
    s_ref  : (B, 1, L) f32 lane-replicated excitation (no sigmoid, per spec)
    """
    sums = sum_ref[...][:, 0, :]                        # (B, L)
    # Fold the lane packing back to channels and take the spatial mean.
    pooled = sums[:, 0:chans]
    for p in range(1, pack):
        pooled = pooled + sums[:, p * chans:(p + 1) * chans]
    pooled = pooled * inv_wh                            # (B, C)

    h = jnp.dot(pooled, w1_ref[...].astype(jnp.float32),
                preferred_element_type=jnp.float32)
    h = jnp.maximum(h + b1_ref[...].astype(jnp.float32), 0.0)        # (B, Cr)
    s = jnp.dot(h, w2_ref[...].astype(jnp.float32),
                preferred_element_type=jnp.float32)
    s = s + b2_ref[...].astype(jnp.float32)                          # (B, L)
    s_ref[...] = s[:, None, :]


def scale_kernel(x_ref, s_ref, o_ref):
    """Lane-dense per-channel scale: o = x * s (s already lane-replicated)."""
    s = s_ref[...].astype(x_ref.dtype)                  # (1, 1, L)
    o_ref[...] = x_ref[...] * s                         # (1, T, L)


# ----------------------------- wrapper -------------------------------------


def _rows_tile(rows, lane, itemsize, target_bytes=1 << 19):
    """Largest multiple-of-8 divisor of `rows` whose tile fits target_bytes."""
    if rows % 8 != 0:
        return rows                  # block dim must then equal the full dim
    cap = max(8, target_bytes // max(1, lane * itemsize))
    best = 8
    t = 8
    while t <= min(rows, cap):
        if rows % t == 0:
            best = t
        t += 8
    return best


@jax.jit
def se_forward(x, w1, b1, w2, b2):
    """x: [B, W, H, C]; w1: [C, Cr]; b1: [Cr]; w2: [Cr, C]; b2: [C]."""
    B, W, H, C = x.shape
    Cr = w1.shape[1]
    WH = W * H

    # Lane packing: pack P spatial positions per 128-lane row when C | 128.
    if C < 128 and 128 % C == 0 and WH % (128 // C) == 0:
        P = 128 // C
    else:
        P = 1                        # C % 128 == 0 is already lane-dense;
                                     # other C fall back to masked stores.
    L = P * C
    rows = WH // P
    x_view = x.reshape(B, rows, L)

    T = _rows_tile(rows, L, jnp.dtype(x.dtype).itemsize)
    n_tiles = rows // T

    # Phase 1: lane-packed spatial sums per batch (f32), spatial axis tiled.
    sums = pl.pallas_call(
        pool_kernel,
        out_shape=jax.ShapeDtypeStruct((B, 1, L), jnp.float32),
        grid=(B, n_tiles),
        in_specs=[pl.BlockSpec((1, T, L), lambda b, t: (b, t, 0))],
        out_specs=pl.BlockSpec((1, 1, L), lambda b, t: (b, 0, 0)),
        compiler_params=pltpu.CompilerParams(
            dimension_semantics=("parallel", "arbitrary")),
    )(x_view)

    # Phase 2: batched squeeze/excite matmuls; lane-replicate via the weights.
    w2_wide = jnp.tile(w2, (1, P))                      # (Cr, L)
    b2_wide = jnp.tile(b2, (P,)).reshape(1, L)          # (1, L)
    b1_2d = b1.reshape(1, Cr)
    s_wide = pl.pallas_call(
        functools.partial(excite_kernel, inv_wh=1.0 / WH, pack=P, chans=C),
        out_shape=jax.ShapeDtypeStruct((B, 1, L), jnp.float32),
    )(sums, w1, b1_2d, w2_wide, b2_wide)

    # Phase 3: lane-dense elementwise scale; both grid axes parallel so the
    # two v7x TensorCores share work even for B == 1.
    # (If the caller can donate x, add input_output_aliases={0: 0} here to
    #  reuse its HBM buffer for the output.)
    out = pl.pallas_call(
        scale_kernel,
        out_shape=jax.ShapeDtypeStruct((B, rows, L), x.dtype),
        grid=(B, n_tiles),
        in_specs=[pl.BlockSpec((1, T, L), lambda b, t: (b, t, 0)),
                  pl.BlockSpec((1, 1, L), lambda b, t: (b, 0, 0))],
        out_specs=pl.BlockSpec((1, T, L), lambda b, t: (b, t, 0)),
        compiler_params=pltpu.CompilerParams(
            dimension_semantics=("parallel", "parallel")),
    )(x_view, s_wide)

    return out.reshape(B, W, H, C)


def se_reference(x, w1, b1, w2, b2):
    """Pure-JAX reference of the PyTorch forward (channels-last layout)."""
    pooled = jnp.mean(x, axis=(1, 2))                   # (B, C)
    h = jnp.maximum(pooled @ w1 + b1, 0.0)              # (B, Cr)
    s = h @ w2 + b2                                     # (B, C)  -- no sigmoid
    return x * s[:, None, None, :]


if __name__ == "__main__":
    # Small shapes consistent with the module: in_chnls=64, ratio=16 -> Cr=4
    B, W, H, C = 2, 8, 8, 64
    ratio = 16
    Cr = C // ratio

    key = jax.random.PRNGKey(0)
    kx, k1, kb1, k2, kb2 = jax.random.split(key, 5)

    x = jax.random.normal(kx, (B, W, H, C), dtype=jnp.float32)
    # Conv2d(C, Cr, 1) weight is [Cr, C, 1, 1]; matmul form is its transpose [C, Cr]
    w1 = 0.1 * jax.random.normal(k1, (C, Cr), dtype=jnp.float32)
    b1 = 0.1 * jax.random.normal(kb1, (Cr,), dtype=jnp.float32)
    # Conv2d(Cr, C, 1) weight is [C, Cr, 1, 1]; matmul form is its transpose [Cr, C]
    w2 = 0.1 * jax.random.normal(k2, (Cr, C), dtype=jnp.float32)
    b2 = 0.1 * jax.random.normal(kb2, (C,), dtype=jnp.float32)

    out = jax.block_until_ready(se_forward(x, w1, b1, w2, b2))
    ref = se_reference(x, w1, b1, w2, b2)

    assert out.shape == (B, W, H, C)
    assert jnp.allclose(out, ref, atol=1e-5, rtol=1e-5)

    print("KERNEL_OK")
</pallas_src>

<mosaic_0001>
module attributes {stable_mosaic.version = 11 : i64} {
  func.func @excite_kernel(%arg0: memref<2x1x128xf32, #tpu.memory_space<vmem>>, %arg1: memref<64x4xf32, #tpu.memory_space<vmem>>, %arg2: memref<1x4xf32, #tpu.memory_space<vmem>>, %arg3: memref<4x128xf32, #tpu.memory_space<vmem>>, %arg4: memref<1x128xf32, #tpu.memory_space<vmem>>, %arg5: memref<2x1x128xf32, #tpu.memory_space<vmem>>) attributes {dimension_semantics = [], scalar_prefetch = 0 : i64, scratch_operands = 0 : i64, tpu.core_type = #tpu.core_type<tc>} {
    %c0 = arith.constant 0 : index
    %c0_0 = arith.constant 0 : index
    %c0_1 = arith.constant 0 : index
    %0 = vector.load %arg0[%c0, %c0_0, %c0_1] : memref<2x1x128xf32, #tpu.memory_space<vmem>>, vector<2x1x128xf32>
    %1 = vector.shape_cast %0 : vector<2x1x128xf32> to vector<2x128xf32>
    %2 = vector.extract_strided_slice %1 {offsets = [0, 0], sizes = [2, 64], strides = [1, 1]} : vector<2x128xf32> to vector<2x64xf32>
    %3 = vector.extract_strided_slice %1 {offsets = [0, 64], sizes = [2, 64], strides = [1, 1]} : vector<2x128xf32> to vector<2x64xf32>
    %4 = arith.addf %2, %3 : vector<2x64xf32>
    %cst = arith.constant 1.562500e-02 : f32
    %5 = vector.broadcast %cst : f32 to vector<2x64xf32>
    %6 = arith.mulf %4, %5 : vector<2x64xf32>
    %c0_2 = arith.constant 0 : index
    %c0_3 = arith.constant 0 : index
    %7 = vector.load %arg1[%c0_2, %c0_3] : memref<64x4xf32, #tpu.memory_space<vmem>>, vector<64x4xf32>
    %cst_4 = arith.constant dense<0.000000e+00> : vector<2x4xf32>
    %8 = tpu.matmul %6, %7, %cst_4 {dimension_numbers = #tpu.dot_dimension_numbers<[1], [0], [0], [1], [0, 0, 1, 1], [], []>} : vector<2x64xf32>, vector<64x4xf32>, vector<2x4xf32> -> vector<2x4xf32>
    %c0_5 = arith.constant 0 : index
    %c0_6 = arith.constant 0 : index
    %9 = vector.load %arg2[%c0_5, %c0_6] : memref<1x4xf32, #tpu.memory_space<vmem>>, vector<1x4xf32>
    %10 = vector.broadcast %9 : vector<1x4xf32> to vector<2x4xf32>
    %11 = arith.addf %8, %10 : vector<2x4xf32>
    %cst_7 = arith.constant 0.000000e+00 : f32
    %12 = vector.broadcast %cst_7 : f32 to vector<2x4xf32>
    %13 = arith.maximumf %11, %12 : vector<2x4xf32>
    %c0_8 = arith.constant 0 : index
    %c0_9 = arith.constant 0 : index
    %14 = vector.load %arg3[%c0_8, %c0_9] : memref<4x128xf32, #tpu.memory_space<vmem>>, vector<4x128xf32>
    %cst_10 = arith.constant dense<0.000000e+00> : vector<2x128xf32>
    %15 = tpu.matmul %13, %14, %cst_10 {dimension_numbers = #tpu.dot_dimension_numbers<[1], [0], [0], [1], [0, 0, 1, 1], [], []>} : vector<2x4xf32>, vector<4x128xf32>, vector<2x128xf32> -> vector<2x128xf32>
    %c0_11 = arith.constant 0 : index
    %c0_12 = arith.constant 0 : index
    %16 = vector.load %arg4[%c0_11, %c0_12] : memref<1x128xf32, #tpu.memory_space<vmem>>, vector<1x128xf32>
    %17 = vector.broadcast %16 : vector<1x128xf32> to vector<2x128xf32>
    %18 = arith.addf %15, %17 : vector<2x128xf32>
    %19 = vector.shape_cast %18 : vector<2x128xf32> to vector<2x1x128xf32>
    %c0_13 = arith.constant 0 : index
    %c0_14 = arith.constant 0 : index
    %c0_15 = arith.constant 0 : index
    %20 = vector.load %arg5[%c0_13, %c0_14, %c0_15] : memref<2x1x128xf32, #tpu.memory_space<vmem>>, vector<2x1x128xf32>
    tpu.vector_store %arg5[%c0_13, %c0_14, %c0_15], %19 {strides = array<i32>} : memref<2x1x128xf32, #tpu.memory_space<vmem>>, vector<2x1x128xf32>,
    return
  }
}

module attributes {stable_mosaic.version = 11 : i64} {
  func.func @pool_kernel(%arg0: i32, %arg1: i32, %arg2: memref<1x32x128xf32, #tpu.memory_space<vmem>>, %arg3: memref<1x1x128xf32, #tpu.memory_space<vmem>>) attributes {dimension_semantics = [#tpu.dimension_semantics<parallel>, #tpu.dimension_semantics<arbitrary>], iteration_bounds = array<i64: 2, 1>, scalar_prefetch = 0 : i64, scratch_operands = 0 : i64, tpu.core_type = #tpu.core_type<tc>, window_params = [{transform_indices = @transform_0, window_bounds = array<i64: 1, 32, 128>}, {transform_indices = @transform_1, window_bounds = array<i64: 1, 1, 128>}]} {
    %c0_i32 = arith.constant 0 : i32
    %0 = arith.cmpi eq, %arg1, %c0_i32 : i32
    %1 = arith.extui %0 : i1 to i32
    %c0_i32_0 = arith.constant 0 : i32
    %2 = arith.cmpi ne, %1, %c0_i32_0 : i32
    scf.if %2 {
      %cst_10 = arith.constant 0.000000e+00 : f32
      %11 = vector.broadcast %cst_10 : f32 to vector<1x1x128xf32>
      %c0_11 = arith.constant 0 : index
      %c0_12 = arith.constant 0 : index
      %c0_13 = arith.constant 0 : index
      %12 = vector.load %arg3[%c0_11, %c0_12, %c0_13] : memref<1x1x128xf32, #tpu.memory_space<vmem>>, vector<1x1x128xf32>
      tpu.vector_store %arg3[%c0_11, %c0_12, %c0_13], %11 {strides = array<i32>} : memref<1x1x128xf32, #tpu.memory_space<vmem>>, vector<1x1x128xf32>,
    } else {
    }
    %c0 = arith.constant 0 : index
    %c0_1 = arith.constant 0 : index
    %c0_2 = arith.constant 0 : index
    %3 = vector.load %arg2[%c0, %c0_1, %c0_2] : memref<1x32x128xf32, #tpu.memory_space<vmem>>, vector<1x32x128xf32>
    %4 = vector.shape_cast %3 : vector<1x32x128xf32> to vector<32x128xf32>
    %cst = arith.constant 1.000000e+00 : f32
    %5 = vector.broadcast %cst : f32 to vector<1x32xf32>
    %cst_3 = arith.constant dense<0.000000e+00> : vector<1x128xf32>
    %6 = tpu.matmul %5, %4, %cst_3 {dimension_numbers = #tpu.dot_dimension_numbers<[1], [0], [0], [1], [0, 0, 1, 1], [], []>} : vector<1x32xf32>, vector<32x128xf32>, vector<1x128xf32> -> vector<1x128xf32>
    %c0_4 = arith.constant 0 : index
    %c0_5 = arith.constant 0 : index
    %c0_6 = arith.constant 0 : index
    %7 = vector.load %arg3[%c0_4, %c0_5, %c0_6] : memref<1x1x128xf32, #tpu.memory_space<vmem>>, vector<1x1x128xf32>
    %8 = vector.shape_cast %6 : vector<1x128xf32> to vector<1x1x128xf32>
    %9 = arith.addf %7, %8 : vector<1x1x128xf32>
    %c0_7 = arith.constant 0 : index
    %c0_8 = arith.constant 0 : index
    %c0_9 = arith.constant 0 : index
    %10 = vector.load %arg3[%c0_7, %c0_8, %c0_9] : memref<1x1x128xf32, #tpu.memory_space<vmem>>, vector<1x1x128xf32>
    tpu.vector_store %arg3[%c0_7, %c0_8, %c0_9], %9 {strides = array<i32>} : memref<1x1x128xf32, #tpu.memory_space<vmem>>, vector<1x1x128xf32>,
    return
  }
  func.func @transform_0(%arg0: i32, %arg1: i32) -> (i32, i32, i32) {
    %c0_i32 = arith.constant 0 : i32
    %c0_i32_0 = arith.constant 0 : i32
    return %arg0, %arg1, %c0_i32 : i32, i32, i32
  }
  func.func @transform_1(%arg0: i32, %arg1: i32) -> (i32, i32, i32) {
    %c0_i32 = arith.constant 0 : i32
    %c0_i32_0 = arith.constant 0 : i32
    %c0_i32_1 = arith.constant 0 : i32
    return %arg0, %c0_i32, %c0_i32_0 : i32, i32, i32
  }
}

module attributes {stable_mosaic.version = 11 : i64} {
  func.func @scale_kernel(%arg0: i32, %arg1: i32, %arg2: memref<1x32x128xf32, #tpu.memory_space<vmem>>, %arg3: memref<1x1x128xf32, #tpu.memory_space<vmem>>, %arg4: memref<1x32x128xf32, #tpu.memory_space<vmem>>) attributes {dimension_semantics = [#tpu.dimension_semantics<parallel>, #tpu.dimension_semantics<parallel>], iteration_bounds = array<i64: 2, 1>, scalar_prefetch = 0 : i64, scratch_operands = 0 : i64, tpu.core_type = #tpu.core_type<tc>, window_params = [{transform_indices = @transform_0, window_bounds = array<i64: 1, 32, 128>}, {transform_indices = @transform_1, window_bounds = array<i64: 1, 1, 128>}, {transform_indices = @transform_2, window_bounds = array<i64: 1, 32, 128>}]} {
    %c0 = arith.constant 0 : index
    %c0_0 = arith.constant 0 : index
    %c0_1 = arith.constant 0 : index
    %0 = vector.load %arg3[%c0, %c0_0, %c0_1] : memref<1x1x128xf32, #tpu.memory_space<vmem>>, vector<1x1x128xf32>
    %c0_2 = arith.constant 0 : index
    %c0_3 = arith.constant 0 : index
    %c0_4 = arith.constant 0 : index
    %1 = vector.load %arg2[%c0_2, %c0_3, %c0_4] : memref<1x32x128xf32, #tpu.memory_space<vmem>>, vector<1x32x128xf32>
    %2 = vector.broadcast %0 : vector<1x1x128xf32> to vector<1x32x128xf32>
    %3 = arith.mulf %1, %2 : vector<1x32x128xf32>
    %c0_5 = arith.constant 0 : index
    %c0_6 = arith.constant 0 : index
    %c0_7 = arith.constant 0 : index
    %4 = vector.load %arg4[%c0_5, %c0_6, %c0_7] : memref<1x32x128xf32, #tpu.memory_space<vmem>>, vector<1x32x128xf32>
    tpu.vector_store %arg4[%c0_5, %c0_6, %c0_7], %3 {strides = array<i32>} : memref<1x32x128xf32, #tpu.memory_space<vmem>>, vector<1x32x128xf32>,
    return
  }
  func.func @transform_0(%arg0: i32, %arg1: i32) -> (i32, i32, i32) {
    %c0_i32 = arith.constant 0 : i32
    %c0_i32_0 = arith.constant 0 : i32
    return %arg0, %arg1, %c0_i32 : i32, i32, i32
  }
  func.func @transform_1(%arg0: i32, %arg1: i32) -> (i32, i32, i32) {
    %c0_i32 = arith.constant 0 : i32
    %c0_i32_0 = arith.constant 0 : i32
    %c0_i32_1 = arith.constant 0 : i32
    return %arg0, %c0_i32, %c0_i32_0 : i32, i32, i32
  }
  func.func @transform_2(%arg0: i32, %arg1: i32) -> (i32, i32, i32) {
    %c0_i32 = arith.constant 0 : i32
    %c0_i32_0 = arith.constant 0 : i32
    return %arg0, %arg1, %c0_i32 : i32, i32, i32
  }
}

</mosaic_0001>

<bundles_post_ra>
// kernel: tile.18
= control target key start
LH: loop header
LB: loop body
LE: loop exit
PB: predicated region body
PF: predicated region fallthrough
CT: control target
= control target key end

     0   :  { %s22_s0 = inlined_call_operand.vmem [shape: f32[64], index: 0, kind: input, shape index: {}]   ;;  %s23_s1 = inlined_call_operand.vmem [shape: f32[2,64], index: 1, kind: output, shape index: {}]  }
   0x1   :  { %v4_v0 = vld [vmem:[%s22_s0] ss:$0 sm:$0xff] }
   0x2   :  { %5 = vst [vmem:[%s23_s1] sm:$0x3] %v4_v0 }

// kernel: tile.14
= control target key start
LH: loop header
LB: loop body
LE: loop exit
PB: predicated region body
PF: predicated region fallthrough
CT: control target
= control target key end

     0   :  { %vm21_vm0 = vcmask 523264   ;;  %vm27_vm1 = vcmask 1048064   ;;  %s67_s0 = inlined_call_operand.vmem [shape: f32[4,2,64], index: 0, kind: input, shape index: {}]   ;;  %s68_s1 = inlined_call_operand.vmem [shape: f32[4,128], index: 1, kind: output, shape index: {}]  }
   0x1   :  { %v37_v0 = vld [vmem:[%s67_s0 + $0x6] sm:$0x3]  ;;  %v38_v1 = vld [vmem:[%s67_s0 + $0x4] sm:$0x3]  ;;  %v39_v2 = vld [vmem:[%s67_s0 + $0x2] sm:$0x3] }
   0x2   :  { %8 = vst [vmem:[#allocation1 + $0x18] sm:$0x3] %v37_v0  ;;  %13 = vst [vmem:[#allocation1 + $0x10] sm:$0x3] %v38_v1  ;;  %v18_v3 = vld [vmem:[%s67_s0] sm:$0x3] }
   0x3   :  { %17 = vst [vmem:[#allocation1 + $0x8] sm:$0x3] %v39_v2  ;;  %19 = vst [vmem:[#allocation1] sm:$0x3] %v18_v3  ;;  %s41_s0 = smov 64  }
   0xa   :  { %v24_v4 = vld [vmem:[#allocation1 + $0x1] ss:$8 sm:$0xf]   ;;  %v20_v5 = vld [vmem:[#allocation1] ss:$8 sm:$0xf]  }
   0xb   :  { %25 = vrot.lane.b32.xlu0 %v24_v4, %s41_s0  ;;  %22 = vst.msk [vmem:[#allocation0] sm:$0xf] %vm21_vm0, %v20_v5  }
  0x7d   :  { %v26_v6 = vpop.permute.xlu0 %25  }
  0x7e   :  { %28 = vst.msk [vmem:[#allocation0] sm:$0xf] %vm27_vm1, %v26_v6  }
  0x85   :  { %v32_v7 = vld [vmem:[#allocation0] sm:$0xf] }
  0x86   :  { %34 = vst [vmem:[%s68_s1] sm:$0xf] %v32_v7 }

// kernel: tile.19
= control target key start
LH: loop header
LB: loop body
LE: loop exit
PB: predicated region body
PF: predicated region fallthrough
CT: control target
= control target key end

     0   :  { %vm7_vm0 = vcmask 523264   ;;  %vm13_vm1 = vcmask 1048064   ;;  %s39_s0 = inlined_call_operand.vmem [shape: f32[2,64], index: 0, kind: input, shape index: {}]   ;;  %s40_s1 = inlined_call_operand.vmem [shape: f32[1,128], index: 1, kind: output, shape index: {}]  }
   0x1   :  { %v4_v0 = vld [vmem:[%s39_s0] sm:$0x3]  ;;  %s22_s0 = smov 64  }
   0x2   :  { %5 = vst [vmem:[#allocation1] sm:$0x3] %v4_v0 }
   0x9   :  { %v10_v1 = vld [vmem:[#allocation1 + $0x1] sm:$0x1]   ;;  %v6_v2 = vld [vmem:[#allocation1] sm:$0x1]  }
   0xa   :  { %11 = vrot.lane.b32.xlu0 %v10_v1, %s22_s0  ;;  %8 = vst.msk [vmem:[#allocation0] sm:$0x1] %vm7_vm0, %v6_v2  }
  0x7c   :  { %v12_v3 = vpop.permute.xlu0 %11  }
  0x7d   :  { %14 = vst.msk [vmem:[#allocation0] sm:$0x1] %vm13_vm1, %v12_v3  }
  0x84   :  { %v18_v4 = vld [vmem:[#allocation0] sm:$0x1] }
  0x85   :  { %20 = vst [vmem:[%s40_s1] sm:$0x1] %v18_v4 }

// kernel: se_forward.5
= control target key start
LH: loop header
LB: loop body
LE: loop exit
PB: predicated region body
PF: predicated region fallthrough
CT: control target
= control target key end

     0   :  { %s389_s9 = smov 0   ;;  %s391_s10 = smov 0   ;;  %s422_s0 = inlined_call_operand.vmem [shape: f32[2,32,128], index: 0, kind: input, shape index: {}]   ;;  %s423_s1 = inlined_call_operand.vmem [shape: f32[2,1,128], index: 1, kind: input, shape index: {}]   ;;  %s424_s2 = inlined_call_operand.vmem [shape: f32[2,32,128], index: 2, kind: output, shape index: {}]  }
   0x1   :  { %s393_s11 = smov 0  }
   0x2 LB: > { %s24_s12 = sadd.s32 1, %s368_s10  ;;  %p316_p0 = scmp.ge.s32.totalorder %s372_s11, 1  ;;  %s372_s11 = sphi %s393_s11, %s12_s11   ;;  %s368_s10 = sphi %s391_s10, %s426_s10   ;;  %s364_s9 = sphi %s389_s9, %s425_s9  }
   0x3   : > { %p26_p1 = scmp.ge.s32.totalorder %s24_s12, 2  ;;  %p141_p2 = scmp.lt.s32.totalorder %s372_s11, 3 }
   0x5   : > { %s428_s12 = smov (%p26_p1, %s24_s12), 0  ;;  %p142_p3 = pnand %p316_p0, %p141_p2 }
   0x6   : > { %p175_p4 = scmp.lt.s32.totalorder (!%p142_p3), %s364_s9, 1 }
   0x7   : > { %145 = sbr.rel (%p142_p3) target bundleno = 22 (0x16), region = 28 }
   0xe   : > { %s430_s9 = smov (!%p175_p4, %s364_s9), 1 }
   0xf   : > { %s324_s13 = sshll.u32 %s430_s9, 5  ;;  %s186_s16 = scalar_lea.vmem %s423_s1, %s430_s9 }
  0x10   : > { %s182_s19 = scalar_lea.vmem %s422_s0, %s324_s13  ;;  %v321_v0 = vld [vmem:[%s186_s16] ss:$0 sm:$0xff]  ;;  %s195_s22 = scalar_lea.vmem %s424_s2, %s324_s13 }
  0x11   : > { %v198_v1 = vld [vmem:[%s182_s19] sm:$0xff]  ;;  %v199_v2 = vld [vmem:[%s182_s19 + $0x8] sm:$0xff]  ;;  %v200_v3 = vld [vmem:[%s182_s19 + $0x10] sm:$0xff] }
  0x12   : > { %v208_v4 = vmul.f32 %v321_v0, %v198_v1  ;;  %v209_v5 = vmul.f32 %v321_v0, %v199_v2  ;;  %v210_v6 = vmul.f32 %v321_v0, %v200_v3  ;;  %v201_v7 = vld [vmem:[%s182_s19 + $0x18] sm:$0xff] }
  0x13   : > { %v211_v8 = vmul.f32 %v321_v0, %v201_v7 }
  0x14   : > { %212 = vst [vmem:[%s195_s22] sm:$0xff] %v208_v4  ;;  %213 = vst [vmem:[%s195_s22 + $0x8] sm:$0xff] %v209_v5 }
  0x15   : > { %214 = vst [vmem:[%s195_s22 + $0x10] sm:$0xff] %v210_v6  ;;  %215 = vst [vmem:[%s195_s22 + $0x18] sm:$0xff] %v211_v8 }
  0x16 PF: > { %s12_s11 = sadd.s32 1, %s372_s11   ;;  %s425_s9 = smov %s368_s10 }
  0x17   : > { %p9_p5 = scmp.ge.s32.totalorder %s12_s11, 4   ;;  %s426_s10 = smov %s428_s12 }
  0x19   :  { %11 = sbr.rel (!%p9_p5) target bundleno = 2 (0x2), region = 61 }

// kernel: se_forward.3
= control target key start
LH: loop header
LB: loop body
LE: loop exit
PB: predicated region body
PF: predicated region fallthrough
CT: control target
= control target key end

     0   :  { %s387_s6 = smov 0   ;;  %s389_s7 = smov 0   ;;  %s420_s0 = inlined_call_operand.vmem [shape: f32[2,32,128], index: 0, kind: input, shape index: {}]   ;;  %s421_s1 = inlined_call_operand.vmem [shape: f32[2,1,128], index: 1, kind: output, shape index: {}]  }
   0x1   :  { %s391_s8 = smov 0  }
   0x2 LB: > { %s23_s9 = sadd.s32 1, %s367_s7  ;;  %p292_p0 = scmp.ge.s32.totalorder %s371_s8, 1  ;;  %s371_s8 = sphi %s391_s8, %s11_s8   ;;  %s367_s7 = sphi %s389_s7, %s423_s7   ;;  %s363_s6 = sphi %s387_s6, %s422_s6  }
   0x3   : > { %p25_p1 = scmp.ge.s32.totalorder %s23_s9, 2  ;;  %p106_p2 = scmp.lt.s32.totalorder %s371_s8, 3 }
   0x5   : > { %s425_s9 = smov (%p25_p1, %s23_s9), 0  ;;  %p107_p3 = pnand %p292_p0, %p106_p2 }
   0x6   : > { %p129_p4 = scmp.lt.s32.totalorder (!%p107_p3), %s363_s6, 1  ;;  %v373_v0 = vmov (!%p107_p3), 0.0|0.0   ;;  %vm374_vm0 = vmmov (!%p107_p3), 0   ;;  %v375_v1 = vmov (!%p107_p3), 0.0   ;;  %vm150_vm1 = vcmask (!%p107_p3), 261120  }
   0x7   : > { %110 = sbr.rel (%p107_p3) target bundleno = 242 (0xf2), region = 24  ;;  %315 = vmatprep.subr.bf16.mxu0 (!%p107_p3), %v373_v0  ;;  %312 = vmatprep.mubr.msk.f32.mxu0 (!%p107_p3), %vm374_vm0, %v375_v1  ;;  %v376_v8 = vmov (!%p107_p3), 1.0  }
   0xe   : > { %s427_s6 = smov (!%p129_p4, %s363_s6), 1 }
   0xf   : > { %s298_s10 = sshll.u32 %s427_s6, 5  ;;  %s140_s13 = scalar_lea.vmem %s421_s1, %s427_s6 }
  0x10   : > { %s136_s16 = scalar_lea.vmem %s420_s0, %s298_s10  ;;  %145 = vst [vmem:[%s140_s13] sm:$0x1] %v375_v1 }
  0x11   : > { %v146_v2 = vld [vmem:[%s136_s16] sm:$0xff]  ;;  %v147_v3 = vld [vmem:[%s136_s16 + $0x8] sm:$0xff]  ;;  %v148_v4 = vld [vmem:[%s136_s16 + $0x10] sm:$0xff] }
  0x12   : > { %v316_v5 = vpack.c.bf16 %v147_v3, %v146_v2  ;;  %v149_v6 = vld [vmem:[%s136_s16 + $0x18] sm:$0xff] }
  0x13   : > { %v319_v7 = vpack.c.bf16 %v149_v6, %v148_v4 }
  0x14   : > { %317 = vmatpush3.bf16.msra.mxu0 %v316_v5 }
  0x15   : > { %318 = vmatprep.subr.bf16.mxu0 %v373_v0 }
  0x17   : > { %v224_v9 = vld [vmem:[%s140_s13] sm:$0x1] }
  0x18   : > { %320 = vmatpush3.bf16.msra.mxu0 %v319_v7 }
  0x1b   : > { %313 = vmatmul.mubr.msk.f32.vlgmr.msra.gmra.mrb[0].mxu0 %vm150_vm1, %v376_v8 }
  0xee   : > { %v220_v10 = vpop.f32.mrb[0].mxu0 }
  0xef   : > { %v225_v11 = vadd.f32 %v224_v9, %v220_v10  ;;  %v314_v12 = vpop.f32.mrb[1].mxu0 }
  0xf1   : > { %226 = vst [vmem:[%s140_s13] sm:$0x1] %v225_v11 }
  0xf2 PF: > { %s11_s8 = sadd.s32 1, %s371_s8   ;;  %s422_s6 = smov %s367_s7 }
  0xf3   : > { %p8_p5 = scmp.ge.s32.totalorder %s11_s8, 4   ;;  %s423_s7 = smov %s425_s9 }
  0xf5   :  { %10 = sbr.rel (!%p8_p5) target bundleno = 2 (0x2), region = 58 }

// kernel: se_forward.4
= control target key start
LH: loop header
LB: loop body
LE: loop exit
PB: predicated region body
PF: predicated region fallthrough
CT: control target
= control target key end

     0   :  { %v316_v1 = vmov 0.0|0.0   ;;  %s317_s22 = smov 64   ;;  %vm318_vm0 = vmmov 0   ;;  %v319_v8 = vmov 0.0   ;;  %v320_v16 = vmov 1966171168   ;;  %s396_s0 = inlined_call_operand.vmem [shape: f32[2,1,128], index: 0, kind: input, shape index: {}]   ;;  %s397_s1 = inlined_call_operand.vmem [shape: f32[64,4], index: 1, kind: input, shape index: {}]   ;;  %s398_s3 = inlined_call_operand.vmem [shape: f32[4,128], index: 3, kind: input, shape index: {}]   ;;  %s399_s2 = inlined_call_operand.vmem [shape: f32[1,4], index: 2, kind: input, shape index: {}]   ;;  %s400_s4 = inlined_call_operand.vmem [shape: f32[1,128], index: 4, kind: input, shape index: {}]   ;;  %s401_s5 = inlined_call_operand.vmem [shape: f32[2,1,128], index: 5, kind: output, shape index: {}]  }
   0x1   :  { %v20_v0 = vld [vmem:[%s396_s0] sm:$0x1]  ;;  %299 = vmatprep.subr.bf16.mxu0 %v316_v1  ;;  %v35_v3 = vld [vmem:[%s397_s1 + $0x8] sm:$0xff]  ;;  %v36_v4 = vld [vmem:[%s397_s1 + $0x10] sm:$0xff]  ;;  %291 = vmatprep.mubr.msk.f32.mxu0 %vm318_vm0, %v319_v8  ;;  %v53_v17 = vunpack.c.l.s4 %v320_v16  ;;  %v55_v18 = vlaneseq  ;;  %vm66_vm1 = vcmask 523264   ;;  %vm152_vm2 = vcmask 1043456  }
   0x2   :  { %v34_v2 = vld [vmem:[%s397_s1] sm:$0xff]  ;;  %24 = vrot.lane.b32.xlu0 %v20_v0, %s317_s22  ;;  %v37_v5 = vld [vmem:[%s397_s1 + $0x18] sm:$0xff]  ;;  %294 = vmatprep.subr.mxu1 %v319_v8  ;;  %v39_v11 = vld [vmem:[%s397_s1 + $0x28] sm:$0xff]  ;;  %vm148_vm3 = vcmask 31744  }
   0x3   :  { %v21_v6 = vld [vmem:[%s396_s0 + $0x1] sm:$0x1]  ;;  %v300_v7 = vpack.c.bf16 %v35_v3, %v34_v2  ;;  %296 = vmatprep.mubr.msk.f32.mxu1 %vm318_vm0, %v319_v8  ;;  %v303_v9 = vpack.c.bf16 %v37_v5, %v36_v4  ;;  %v40_v13 = vld [vmem:[%s397_s1 + $0x30] sm:$0xff]  ;;  %v41_v14 = vld [vmem:[%s397_s1 + $0x38] sm:$0xff]  ;;  %v54_v21 = vunpack.c.0.s8 %v53_v17  ;;  %v56_v22 = vshrl.u32 %v55_v18, 7 }
   0x4   :  { %v38_v10 = vld [vmem:[%s397_s1 + $0x20] sm:$0xff]  ;;  %v309_v15 = vpack.c.bf16 %v41_v14, %v40_v13 }
   0x5   :  { %301 = vmatpush3.bf16.msra.mxu0 %v300_v7  ;;  %v306_v12 = vpack.c.bf16 %v39_v11, %v38_v10  ;;  %v57_v26 = vsub.s32 %v54_v21, %v56_v22  ;;  %v140_v31 = vld [vmem:[%s398_s3] sm:$0xf] }
   0x6   :  { %26 = vrot.lane.b32.xlu0 %v21_v6, %s317_s22  ;;  %302 = vmatprep.subr.bf16.mxu0 %v316_v1  ;;  %v257_v32 = vld [vmem:[%s399_s2] ss:$0 sm:$0xff] }
   0x7   :  { %295 = vmatpush3.msk.msra.mxu1 %vm152_vm2, %v140_v31  ;;  %v259_v37 = vld [vmem:[%s400_s4] ss:$0 sm:$0xff] }
   0x9   :  { %304 = vmatpush3.bf16.msra.mxu0 %v303_v9 }
   0xa   :  { %305 = vmatprep.subr.bf16.mxu0 %v316_v1 }
   0xd   :  { %307 = vmatpush3.bf16.msra.mxu0 %v306_v12 }
   0xe   :  { %308 = vmatprep.subr.bf16.mxu0 %v316_v1 }
  0x11   :  { %310 = vmatpush3.bf16.msra.mxu0 %v309_v15 }
  0x74   :  { %v25_v19 = vpop.permute.xlu0 %24 }
  0x75   :  { %v30_v20 = vadd.f32 %v25_v19, %v20_v0 }
  0x77   :  { %v32_v25 = vmul.f32 0.015625, %v30_v20 }
  0x78   :  { %v27_v23 = vpop.permute.xlu0 %26 }
  0x79   :  { %v31_v24 = vadd.f32 %v27_v23, %v21_v6 }
  0x7b   :  { %v33_v27 = vmul.f32 0.015625, %v31_v24 }
  0x7d   :  { %v51_v28 = vcombine.low %v32_v25, %v33_v27 }
  0x7f   :  { %v58_v29 = vrot.slane %v51_v28, %v57_v26 }
  0x81   :  { %v65_v30 = vrot.slane %v58_v29, %v57_v26 }
  0x83   :  { %292 = vmatmul.mubr.msk.f32.vlgmr.msra.gmra.mrb[0].mxu0 %vm66_vm1, %v65_v30 }
 0x156   :  { %v135_v33 = vpop.f32.mrb[0].mxu0 }
 0x157   :  { %v136_v34 = vadd.f32 %v257_v32, %v135_v33  ;;  %v293_v35 = vpop.f32.mrb[1].mxu0 }
 0x159   :  { %v139_v36 = vmax.f32 %v136_v34, 0.0 }
 0x15b   :  { %297 = vmatmul.mubr.msk.f32.vlgmr.msra.gmra.mrb[0].mxu1 %vm148_vm3, %v139_v36 }
 0x22e   :  { %v222_v38 = vpop.f32.mrb[0].mxu1 }
 0x22f   :  { %v223_v39 = vadd.f32 %v259_v37, %v222_v38  ;;  %v298_v40 = vpop.f32.mrb[1].mxu1 }
 0x231   :  { %v233_v41 = vrot.slane %v223_v39, %v57_v26 }
 0x233   :  { %v234_v42 = vcombine.high %v233_v41, %v233_v41  ;;  %262 = vst.sshfl [vmem:[%s401_s5] sm:$0x1 pattern:$0x73625140] %v233_v41 }
 0x235   :  { %263 = vst.sshfl [vmem:[%s401_s5 + $0x1] sm:$0x1 pattern:$0x73625140] %v234_v42 }

</bundles_post_ra>
